<compile_context>
chip_gen: v7x
topology: tpu7x:2x2x1
jax: 0.10.0
libtpu: 0.0.40
codegen_flags: <defaults>
</compile_context>

<pallas_src>
import functools

import jax
import jax.numpy as jnp
import numpy as np
from jax.experimental import pallas as pl
from jax.experimental.pallas import tpu as pltpu


def _round_up(x, m):
    return (x + m - 1) // m * m


def _mlp_kernel(x_ref,
                w1_ref, b1_ref,
                w2_ref, b2_ref,
                w3_ref, b3_ref,
                w4_ref, b4_ref,
                o_ref):
    """Fused 4-layer pointwise MLP on one (C_in, TN) channels-x-points tile."""
    cdt = w1_ref.dtype  # MXU input dtype (bf16 in production, f32 optional)

    # Cast x -> compute dtype *inside* the kernel: no wrapper-side astype pass
    # over HBM; the VPU cast overlaps with this tile's MXU work.
    h = x_ref[0].astype(cdt)                                        # (C0, TN)

    # Layers 1-3: conv + folded eval-mode BN + ReLU.  The MXU accumulates in
    # f32 (preferred_element_type) and the result drops straight to the
    # compute dtype so each layer keeps exactly one live activation buffer.
    h = jnp.dot(w1_ref[...], h, preferred_element_type=jnp.float32).astype(cdt)
    h = jnp.maximum(h + b1_ref[...], 0)

    h = jnp.dot(w2_ref[...], h, preferred_element_type=jnp.float32).astype(cdt)
    h = jnp.maximum(h + b2_ref[...], 0)

    h = jnp.dot(w3_ref[...], h, preferred_element_type=jnp.float32).astype(cdt)
    h = jnp.maximum(h + b3_ref[...], 0)

    # Layer 4: conv + tanh.  Tiny (C_out=3) final layer stays in f32.
    h = jnp.dot(w4_ref[...], h, preferred_element_type=jnp.float32) + b4_ref[...]
    o_ref[0] = jnp.tanh(h).astype(o_ref.dtype)


def _default_tile_n(latent_dim):
    # Small latent: HBM / per-step-overhead bound -> big point tiles.
    # Large latent: MXU/VMEM bound -> keep tiles v7x-safe (64 MiB VMEM).
    return 4096 if latent_dim <= 128 else 1024


def _vmem_budget_bytes(c0, couts, tile_n, compute_dtype):
    """Rough VMEM working-set estimate used to set vmem_limit_bytes."""
    cdt_b = jnp.dtype(compute_dtype).itemsize
    c1, c2, c3, c4 = couts
    # Single-buffered weights (compute dtype) + biases (lane-padded to 128).
    w_bytes = (c1 * c0 + c2 * c1 + c3 * c2 + c4 * c3) * cdt_b
    b_bytes = sum(_round_up(c, 8) * 128 * 4 for c in couts)
    # Double-buffered x input (f32) and output (f32, sublane-padded to 8).
    io_bytes = 2 * c0 * tile_n * 4 + 2 * _round_up(c4, 8) * tile_n * 4
    # Live intermediates: f32 dot result + compute-dtype activation (x2 slack).
    act_bytes = max(c0, c1, c2, c3) * tile_n * (4 + cdt_b) * 2
    est = w_bytes + b_bytes + io_bytes + act_bytes
    # 50% margin; floor at 32 MiB, cap below v7x's 64 MiB physical VMEM.
    return int(min(max(est * 3 // 2, 32 * 1024 * 1024), 56 * 1024 * 1024))


def mlp_adj_pallas(x_ncw, params, *, tile_n=None, compute_dtype=jnp.bfloat16):
    """x_ncw: (B, latent_dim, N) float32 -> (B, 3, N) float32.

    tile_n: points per grid step (multiple of 128). Defaults per latent size.
    compute_dtype: MXU input dtype (bfloat16 default; accumulation is f32).
    """
    (w1, b1), (w2, b2), (w3, b3), (w4, b4) = params
    B, C0, N = x_ncw.shape
    assert C0 == w1.shape[1], "latent dim mismatch"
    if tile_n is None:
        tile_n = _default_tile_n(C0)
    assert tile_n % 128 == 0, "tile_n must be lane-aligned (multiple of 128)"

    c1, c2, c3, c4 = w1.shape[0], w2.shape[0], w3.shape[0], w4.shape[0]

    # Weights to the MXU dtype; biases for layers 1-3 in compute dtype (the
    # bias-add/ReLU runs in compute dtype), final-layer bias in f32.
    ws = [w.astype(compute_dtype) for w in (w1, w2, w3, w4)]
    bs = [b1.astype(compute_dtype), b2.astype(compute_dtype),
          b3.astype(compute_dtype), b4.astype(jnp.float32)]

    # Grid-invariant parameter blocks: single-buffered (DMA'd once; no 2x VMEM).
    def w_spec(co, ci):
        return pl.BlockSpec((co, ci), lambda b, n: (0, 0),
                            pipeline_mode=pl.Buffered(1))

    def b_spec(co):
        return pl.BlockSpec((co, 1), lambda b, n: (0, 0),
                            pipeline_mode=pl.Buffered(1))

    n_tiles = pl.cdiv(N, tile_n)  # ragged last block handled by Pallas masking
    vmem_limit = _vmem_budget_bytes(C0, (c1, c2, c3, c4), tile_n, compute_dtype)

    out = pl.pallas_call(
        _mlp_kernel,
        out_shape=jax.ShapeDtypeStruct((B, c4, N), jnp.float32),
        grid_spec=pltpu.PrefetchScalarGridSpec(
            num_scalar_prefetch=0,
            grid=(B, n_tiles),
            in_specs=[
                pl.BlockSpec((1, C0, tile_n), lambda b, n: (b, 0, n)),
                w_spec(c1, C0), b_spec(c1),
                w_spec(c2, c1), b_spec(c2),
                w_spec(c3, c2), b_spec(c3),
                w_spec(c4, c3), b_spec(c4),
            ],
            out_specs=pl.BlockSpec((1, c4, tile_n), lambda b, n: (b, 0, n)),
        ),
        compiler_params=pltpu.CompilerParams(
            dimension_semantics=("parallel", "parallel"),
            vmem_limit_bytes=vmem_limit),
    )(x_ncw, ws[0], bs[0], ws[1], bs[1], ws[2], bs[2], ws[3], bs[3])
    return out


def _fold_bn(conv_w, conv_b, gamma, beta, running_mean, running_var, eps=1e-5):
    """Fold eval-mode BatchNorm1d into a pointwise conv.

    conv_w: (C_out, C_in) PyTorch Conv1d weight (kernel size 1, squeezed).
    Returns (W_eff, b_eff) with W_eff (C_out, C_in), b_eff (C_out, 1).
    """
    scale = gamma / jnp.sqrt(running_var + eps)            # (C_out,)
    w_eff = conv_w * scale[:, None]                        # (C_out, C_in)
    b_eff = beta + scale * (conv_b - running_mean)         # (C_out,)
    return w_eff, b_eff.reshape(-1, 1)


def make_params(latent_dim, key):
    """Deterministic parameter init mirroring MLPAdj.__init__ shapes."""
    dims = [latent_dim, latent_dim, latent_dim // 2, latent_dim // 4, 3]
    layer_keys = jax.random.split(key, 4)

    layers = []
    for li in range(4):
        cin, cout = dims[li], dims[li + 1]
        kw, kb, kg, kbt, km, kv = jax.random.split(layer_keys[li], 6)
        # PyTorch Conv1d default init: U(-k, k), k = 1/sqrt(cin * kernel_size)
        bound = 1.0 / np.sqrt(cin)
        w = jax.random.uniform(kw, (cout, cin), jnp.float32, -bound, bound)
        b = jax.random.uniform(kb, (cout,), jnp.float32, -bound, bound)
        if li < 3:
            # BatchNorm params (eval mode): non-trivial deterministic values.
            gamma = 1.0 + 0.1 * jax.random.normal(kg, (cout,), jnp.float32)
            beta = 0.1 * jax.random.normal(kbt, (cout,), jnp.float32)
            rmean = 0.05 * jax.random.normal(km, (cout,), jnp.float32)
            rvar = 1.0 + 0.1 * jax.random.uniform(kv, (cout,), jnp.float32)
            layers.append(_fold_bn(w, b, gamma, beta, rmean, rvar))
        else:
            layers.append((w, b.reshape(-1, 1)))
    return layers


def reference_forward(x_ncw, params):
    """Pure-JAX reference of the same (BN-folded, eval-mode) forward, NCW."""
    h = x_ncw  # (B, C, N)
    for li, (w, b) in enumerate(params):
        h = jnp.einsum('oc,bcn->bon', w, h,
                       precision=jax.lax.Precision.HIGHEST) + b[None, :, :]
        h = jnp.maximum(h, 0.0) if li < 3 else jnp.tanh(h)
    return h


if __name__ == "__main__":
    latent_dim = 32
    B, N = 2, 384          # N not a multiple of tile_n -> exercises ragged path
    tile_n = 256           # small demo tile; see docstring for production caps

    key = jax.random.PRNGKey(0)
    k_x, k_p = jax.random.split(key)
    x = jax.random.normal(k_x, (B, latent_dim, N), jnp.float32)
    params = make_params(latent_dim, k_p)
    ref = reference_forward(x, params)

    # f32 MXU path (reference-grade): tight tolerance.
    fn_f32 = jax.jit(functools.partial(mlp_adj_pallas, tile_n=tile_n,
                                       compute_dtype=jnp.float32))
    out_f32 = jax.block_until_ready(fn_f32(x, params))
    assert out_f32.shape == (B, 3, N), out_f32.shape
    np.testing.assert_allclose(np.asarray(out_f32), np.asarray(ref),
                               rtol=5e-3, atol=5e-3)

    # bf16 MXU path (production default): looser tolerance.
    fn_bf16 = jax.jit(functools.partial(mlp_adj_pallas, tile_n=tile_n,
                                        compute_dtype=jnp.bfloat16))
    out_bf16 = jax.block_until_ready(fn_bf16(x, params))
    assert out_bf16.shape == (B, 3, N), out_bf16.shape
    np.testing.assert_allclose(np.asarray(out_bf16), np.asarray(ref),
                               rtol=5e-2, atol=5e-2)

    print("KERNEL_OK")
</pallas_src>

<mosaic_0001>
module attributes {stable_mosaic.version = 11 : i64} {
  func.func @_mlp_kernel(%arg0: i32, %arg1: i32, %arg2: memref<1x32x256xf32, #tpu.memory_space<vmem>>, %arg3: memref<32x32xf32, #tpu.memory_space<vmem>>, %arg4: memref<32x1xf32, #tpu.memory_space<vmem>>, %arg5: memref<16x32xf32, #tpu.memory_space<vmem>>, %arg6: memref<16x1xf32, #tpu.memory_space<vmem>>, %arg7: memref<8x16xf32, #tpu.memory_space<vmem>>, %arg8: memref<8x1xf32, #tpu.memory_space<vmem>>, %arg9: memref<3x8xf32, #tpu.memory_space<vmem>>, %arg10: memref<3x1xf32, #tpu.memory_space<vmem>>, %arg11: memref<1x3x256xf32, #tpu.memory_space<vmem>>) attributes {dimension_semantics = [#tpu.dimension_semantics<parallel>, #tpu.dimension_semantics<parallel>], iteration_bounds = array<i64: 2, 2>, scalar_prefetch = 0 : i64, scratch_operands = 0 : i64, tpu.core_type = #tpu.core_type<tc>, window_params = [{transform_indices = @transform_0, window_bounds = array<i64: 1, 32, 256>}, {pipeline_mode = #tpu.pipeline_mode<synchronous>, transform_indices = @transform_1, window_bounds = array<i64: 32, 32>}, {pipeline_mode = #tpu.pipeline_mode<synchronous>, transform_indices = @transform_2, window_bounds = array<i64: 32, 1>}, {pipeline_mode = #tpu.pipeline_mode<synchronous>, transform_indices = @transform_3, window_bounds = array<i64: 16, 32>}, {pipeline_mode = #tpu.pipeline_mode<synchronous>, transform_indices = @transform_4, window_bounds = array<i64: 16, 1>}, {pipeline_mode = #tpu.pipeline_mode<synchronous>, transform_indices = @transform_5, window_bounds = array<i64: 8, 16>}, {pipeline_mode = #tpu.pipeline_mode<synchronous>, transform_indices = @transform_6, window_bounds = array<i64: 8, 1>}, {pipeline_mode = #tpu.pipeline_mode<synchronous>, transform_indices = @transform_7, window_bounds = array<i64: 3, 8>}, {pipeline_mode = #tpu.pipeline_mode<synchronous>, transform_indices = @transform_8, window_bounds = array<i64: 3, 1>}, {transform_indices = @transform_9, window_bounds = array<i64: 1, 3, 256>}]} {
    %c0 = arith.constant 0 : index
    %c0_0 = arith.constant 0 : index
    %c0_1 = arith.constant 0 : index
    %0 = vector.load %arg2[%c0, %c0_0, %c0_1] : memref<1x32x256xf32, #tpu.memory_space<vmem>>, vector<1x32x256xf32>
    %1 = vector.shape_cast %0 : vector<1x32x256xf32> to vector<32x256xf32>
    %c0_2 = arith.constant 0 : index
    %c0_3 = arith.constant 0 : index
    %2 = vector.load %arg3[%c0_2, %c0_3] : memref<32x32xf32, #tpu.memory_space<vmem>>, vector<32x32xf32>
    %cst = arith.constant dense<0.000000e+00> : vector<32x256xf32>
    %3 = tpu.matmul %2, %1, %cst {dimension_numbers = #tpu.dot_dimension_numbers<[1], [0], [0], [1], [0, 0, 1, 1], [], []>} : vector<32x32xf32>, vector<32x256xf32>, vector<32x256xf32> -> vector<32x256xf32>
    %c0_4 = arith.constant 0 : index
    %c0_5 = arith.constant 0 : index
    %4 = vector.load %arg4[%c0_4, %c0_5] : memref<32x1xf32, #tpu.memory_space<vmem>>, vector<32x1xf32>
    %5 = vector.broadcast %4 : vector<32x1xf32> to vector<32x256xf32>
    %6 = arith.addf %3, %5 : vector<32x256xf32>
    %cst_6 = arith.constant 0.000000e+00 : f32
    %7 = vector.broadcast %cst_6 : f32 to vector<32x256xf32>
    %8 = arith.maximumf %6, %7 : vector<32x256xf32>
    %c0_7 = arith.constant 0 : index
    %c0_8 = arith.constant 0 : index
    %9 = vector.load %arg5[%c0_7, %c0_8] : memref<16x32xf32, #tpu.memory_space<vmem>>, vector<16x32xf32>
    %cst_9 = arith.constant dense<0.000000e+00> : vector<16x256xf32>
    %10 = tpu.matmul %9, %8, %cst_9 {dimension_numbers = #tpu.dot_dimension_numbers<[1], [0], [0], [1], [0, 0, 1, 1], [], []>} : vector<16x32xf32>, vector<32x256xf32>, vector<16x256xf32> -> vector<16x256xf32>
    %c0_10 = arith.constant 0 : index
    %c0_11 = arith.constant 0 : index
    %11 = vector.load %arg6[%c0_10, %c0_11] : memref<16x1xf32, #tpu.memory_space<vmem>>, vector<16x1xf32>
    %12 = vector.broadcast %11 : vector<16x1xf32> to vector<16x256xf32>
    %13 = arith.addf %10, %12 : vector<16x256xf32>
    %cst_12 = arith.constant 0.000000e+00 : f32
    %14 = vector.broadcast %cst_12 : f32 to vector<16x256xf32>
    %15 = arith.maximumf %13, %14 : vector<16x256xf32>
    %c0_13 = arith.constant 0 : index
    %c0_14 = arith.constant 0 : index
    %16 = vector.load %arg7[%c0_13, %c0_14] : memref<8x16xf32, #tpu.memory_space<vmem>>, vector<8x16xf32>
    %cst_15 = arith.constant dense<0.000000e+00> : vector<8x256xf32>
    %17 = tpu.matmul %16, %15, %cst_15 {dimension_numbers = #tpu.dot_dimension_numbers<[1], [0], [0], [1], [0, 0, 1, 1], [], []>} : vector<8x16xf32>, vector<16x256xf32>, vector<8x256xf32> -> vector<8x256xf32>
    %c0_16 = arith.constant 0 : index
    %c0_17 = arith.constant 0 : index
    %18 = vector.load %arg8[%c0_16, %c0_17] : memref<8x1xf32, #tpu.memory_space<vmem>>, vector<8x1xf32>
    %19 = vector.broadcast %18 : vector<8x1xf32> to vector<8x256xf32>
    %20 = arith.addf %17, %19 : vector<8x256xf32>
    %cst_18 = arith.constant 0.000000e+00 : f32
    %21 = vector.broadcast %cst_18 : f32 to vector<8x256xf32>
    %22 = arith.maximumf %20, %21 : vector<8x256xf32>
    %c0_19 = arith.constant 0 : index
    %c0_20 = arith.constant 0 : index
    %23 = vector.load %arg9[%c0_19, %c0_20] : memref<3x8xf32, #tpu.memory_space<vmem>>, vector<3x8xf32>
    %cst_21 = arith.constant dense<0.000000e+00> : vector<3x256xf32>
    %24 = tpu.matmul %23, %22, %cst_21 {dimension_numbers = #tpu.dot_dimension_numbers<[1], [0], [0], [1], [0, 0, 1, 1], [], []>} : vector<3x8xf32>, vector<8x256xf32>, vector<3x256xf32> -> vector<3x256xf32>
    %c0_22 = arith.constant 0 : index
    %c0_23 = arith.constant 0 : index
    %25 = vector.load %arg10[%c0_22, %c0_23] : memref<3x1xf32, #tpu.memory_space<vmem>>, vector<3x1xf32>
    %26 = vector.broadcast %25 : vector<3x1xf32> to vector<3x256xf32>
    %27 = arith.addf %24, %26 : vector<3x256xf32>
    %28 = math.tanh %27 : vector<3x256xf32>
    %c0_24 = arith.constant 0 : index
    %c0_25 = arith.constant 0 : index
    %c0_26 = arith.constant 0 : index
    %29 = vector.load %arg11[%c0_24, %c0_25, %c0_26] : memref<1x3x256xf32, #tpu.memory_space<vmem>>, vector<1x3x256xf32>
    %30 = vector.shape_cast %29 : vector<1x3x256xf32> to vector<3x256xf32>
    %31 = vector.shape_cast %28 : vector<3x256xf32> to vector<1x3x256xf32>
    tpu.vector_store %arg11[%c0_24, %c0_25, %c0_26], %31 {strides = array<i32>} : memref<1x3x256xf32, #tpu.memory_space<vmem>>, vector<1x3x256xf32>,
    return
  }
  func.func @transform_0(%arg0: i32, %arg1: i32) -> (i32, i32, i32) {
    %c0_i32 = arith.constant 0 : i32
    %c0_i32_0 = arith.constant 0 : i32
    return %arg0, %c0_i32, %arg1 : i32, i32, i32
  }
  func.func @transform_1(%arg0: i32, %arg1: i32) -> (i32, i32) {
    %c0_i32 = arith.constant 0 : i32
    %c0_i32_0 = arith.constant 0 : i32
    %c0_i32_1 = arith.constant 0 : i32
    return %c0_i32, %c0_i32_0 : i32, i32
  }
  func.func @transform_2(%arg0: i32, %arg1: i32) -> (i32, i32) {
    %c0_i32 = arith.constant 0 : i32
    %c0_i32_0 = arith.constant 0 : i32
    %c0_i32_1 = arith.constant 0 : i32
    return %c0_i32, %c0_i32_0 : i32, i32
  }
  func.func @transform_3(%arg0: i32, %arg1: i32) -> (i32, i32) {
    %c0_i32 = arith.constant 0 : i32
    %c0_i32_0 = arith.constant 0 : i32
    %c0_i32_1 = arith.constant 0 : i32
    return %c0_i32, %c0_i32_0 : i32, i32
  }
  func.func @transform_4(%arg0: i32, %arg1: i32) -> (i32, i32) {
    %c0_i32 = arith.constant 0 : i32
    %c0_i32_0 = arith.constant 0 : i32
    %c0_i32_1 = arith.constant 0 : i32
    return %c0_i32, %c0_i32_0 : i32, i32
  }
  func.func @transform_5(%arg0: i32, %arg1: i32) -> (i32, i32) {
    %c0_i32 = arith.constant 0 : i32
    %c0_i32_0 = arith.constant 0 : i32
    %c0_i32_1 = arith.constant 0 : i32
    return %c0_i32, %c0_i32_0 : i32, i32
  }
  func.func @transform_6(%arg0: i32, %arg1: i32) -> (i32, i32) {
    %c0_i32 = arith.constant 0 : i32
    %c0_i32_0 = arith.constant 0 : i32
    %c0_i32_1 = arith.constant 0 : i32
    return %c0_i32, %c0_i32_0 : i32, i32
  }
  func.func @transform_7(%arg0: i32, %arg1: i32) -> (i32, i32) {
    %c0_i32 = arith.constant 0 : i32
    %c0_i32_0 = arith.constant 0 : i32
    %c0_i32_1 = arith.constant 0 : i32
    return %c0_i32, %c0_i32_0 : i32, i32
  }
  func.func @transform_8(%arg0: i32, %arg1: i32) -> (i32, i32) {
    %c0_i32 = arith.constant 0 : i32
    %c0_i32_0 = arith.constant 0 : i32
    %c0_i32_1 = arith.constant 0 : i32
    return %c0_i32, %c0_i32_0 : i32, i32
  }
  func.func @transform_9(%arg0: i32, %arg1: i32) -> (i32, i32, i32) {
    %c0_i32 = arith.constant 0 : i32
    %c0_i32_0 = arith.constant 0 : i32
    return %arg0, %c0_i32, %arg1 : i32, i32, i32
  }
}

</mosaic_0001>

<bundles_post_ra>
// kernel: mlp_adj_pallas.1
= control target key start
LH: loop header
LB: loop body
LE: loop exit
PB: predicated region body
PF: predicated region fallthrough
CT: control target
= control target key end

     0   :  { %s2581_s0 = inlined_call_operand.hbm [shape: f32[2,32,384], index: 0, kind: input, shape index: {}]   ;;  %s2582_s1 = inlined_call_operand.vmem [shape: f32[32,32], index: 1, kind: input, shape index: {}]   ;;  %s2583_s2 = inlined_call_operand.vmem [shape: f32[32,1], index: 2, kind: input, shape index: {}]   ;;  %s2584_s3 = inlined_call_operand.vmem [shape: f32[16,32], index: 3, kind: input, shape index: {}]   ;;  %s2585_s4 = inlined_call_operand.vmem [shape: f32[16,1], index: 4, kind: input, shape index: {}]   ;;  %s2586_s5 = inlined_call_operand.vmem [shape: f32[8,16], index: 5, kind: input, shape index: {}]   ;;  %s2587_s6 = inlined_call_operand.vmem [shape: f32[8,1], index: 6, kind: input, shape index: {}]   ;;  %s2588_s7 = inlined_call_operand.vmem [shape: f32[3,8], index: 7, kind: input, shape index: {}]   ;;  %s2589_s8 = inlined_call_operand.vmem [shape: f32[3,1], index: 8, kind: input, shape index: {}]   ;;  %s2590_s9 = inlined_call_operand.vmem [shape: f32[2,3,384], index: 9, kind: output, shape index: {}]  }
   0x1   :  { %2595 = sst [smem:[#allocation11_spill]] %s2590_s9 }
   0x2   :  { %14 = vsyncpa [#allocation3], 0 }
   0x3   :  { %16 = vsyncpa [#allocation3 + $0x1], 0  ;;  %s1947_s30 = smov 0   ;;  %s1949_s10 = smov 0  }
   0x4   :  { %s1951_s11 = smov 0   ;;  %s1953_s12 = smov 0  }
   0x5   :  { %s1955_s13 = smov 0   ;;  %s1957_s14 = smov 0  }
   0x6   :  { %s1959_s15 = smov 0   ;;  %s1961_s16 = smov 0  }
   0x7 LB: > { %2596 = sst [smem:[#allocation6_spill]] %s1804_s11  ;;  %s31_s17 = sadd.s32 1, %s1816_s14  ;;  %s1824_s16 = sphi %s1961_s16, %s22_s16   ;;  %s1820_s15 = sphi %s1959_s15, %s2625_s15   ;;  %s1816_s14 = sphi %s1957_s14, %s2619_s14   ;;  %s1812_s13 = sphi %s1955_s13, %s2624_s13   ;;  %s1808_s12 = sphi %s1953_s12, %s2623_s12   ;;  %s1804_s11 = sphi %s1951_s11, %s2617_s11   ;;  %s1800_s10 = sphi %s1949_s10, %s2622_s10   ;;  %s1796_s30 = sphi %s1947_s30, %s2621_s30  }
   0x8   : > { %2597 = sst [smem:[#allocation7_spill]] %s1816_s14  ;;  %p32_p0 = scmp.ge.s32.totalorder %s31_s17, 2 }
   0x9   : > { %s34_s18 = sadd.s32 1, %s1820_s15  ;;  %s1381_s19 = sadd.s32 4294967295, %s1824_s16  }
   0xa   : > { %p50_p1 = scmp.ne.s32.totalorder %s1804_s11, %s1800_s10  ;;  %s2627_s17 = smov (%p32_p0, %s31_s17), 0 }
   0xb   : > { %2598 = sst [smem:[#allocation8_spill]] %s2627_s17  ;;  %s2629_s18 = smov (!%p32_p0, %s34_s18), %s1820_s15 }
   0xc   : > { %s39_s20 = ssub.s32 %s1816_s14, %s2627_s17  ;;  %p51_p2 = scmp.eq.s32.totalorder %s1824_s16, 0 }
   0xd   : > { %p36_p3 = scmp.ge.s32.totalorder %s2629_s18, 2  ;;  %p56_p4 = scmp.ne.s32.totalorder %s1800_s10, %s1796_s30 }
   0xe   : > { %p52_p5 = por %p51_p2, %p50_p1  ;;  %p57_p6 = scmp.eq.s32.totalorder %s1381_s19, 0 }
   0xf   : > { %s2631_s18 = smov (%p36_p3, %s2629_s18), 0  ;;  %p250_p8 = scmp.eq.s32.totalorder %s1381_s19, 3 }
  0x10   : > { %2599 = sst [smem:[#allocation9_spill]] %s2631_s18  ;;  %p2002_p7 = por %p57_p6, %p56_p4 }
  0x11   : > { %s38_s22 = ssub.s32 %s1820_s15, %s2631_s18  ;;  %s43_s23 = sadd.s32 1, %s1804_s11 }
  0x12   : > { %s40_s24 = sor.u32 %s39_s20, %s38_s22  ;;  %p2012_p9 = por %p250_p8, %p50_p1 }
  0x13   : > { %p41_p10 = scmp.eq.s32.totalorder %s40_s24, 0  ;;  %p1384_p11 = scmp.ge.s32.totalorder %s1824_s16, 4 }
  0x15   : > { %s2017_s26 = scalar_select %p41_p10, %s1804_s11, %s43_s23  }
  0x16   : > { %296 = sbr.rel (%p1384_p11) target bundleno = 66 (0x42), region = 48 }
  0x17   : > { %2602 = sst [smem:[#allocation10_spill]] %s2017_s26 }
  0x1d   : > { %299 = sbr.rel (!%p52_p5) target bundleno = 66 (0x42), region = 52  ;;  %s300_s27 = sand.u32 (%p52_p5), 1, %s1804_s11  }
  0x1e   : > { %s1386_s28 = sshll.u32 (%p52_p5), %s1816_s14, 1  ;;  %s1385_s29 = sshll.u32 (%p52_p5), %s300_s27, 6 }
  0x1f   : > { %s306_s30 = ssub.s32 (%p52_p5), 3, %s1386_s28  ;;  %s2028_s22 = scalar_lea.sflag (%p52_p5), [#allocation3], %s300_s27 }
  0x20   : > { %p307_p12 = scmp.lt.s32.totalorder (%p52_p5), %s306_s30, 2  ;;  %s304_s23 = scalar_lea.vmem (%p52_p5), [#allocation2], %s1385_s29 }
  0x24   : > { %s2633_s30 = smov (!%p307_p12, %s306_s30), 2 }
  0x25   : > { %s2025_s19 = sshll.u32 %s2633_s30, 9 }
  0x26   : > { %s311_s20 = ssub.s32 1024, %s2025_s19 }
  0x27   : > { %312 = vsyncadd %s2028_s22, %s311_s20  ;;  %p1388_p13 = scmp.ne.s32.totalorder %s2025_s19, 0  ;;  %s1459_s24 = smul.u32 12, %s1820_s15 }
  0x28   : > { %s1390_s18 = sshll.u32 %s2633_s30, 3  ;;  %s320_s17 = sshll.u32 %s304_s23, 4  ;;  %s2034_s17 = int_to_ptr.vmem [resolvable:$true] %s320_s17 }
  0x29   : > { %s315_s14 = sadd.s32 %s1459_s24, %s1386_s28  ;;  %s1670_s28 = scalar_lea.hbm %s2581_s0, 3072 }
  0x2a   : > { %s1389_s26 = sshll.u32 %s315_s14, 7 }
  0x2b   : > { %s2039_s27 = scalar_lea.hbm %s2581_s0, %s1389_s26 }
  0x2c   : > { %s1666_s29 = scalar_lea.hbm %s2039_s27, %s2025_s19  ;;  %p1671_p3 = scmp.lt.u32.totalorder %s2039_s27, %s2581_s0 }
  0x2d   : > { %p1667_p0 = scmp.ne.s32.totalorder %s2039_s27, %s1666_s29  ;;  %p1672_p4 = scmp.lt.u32.totalorder %s1670_s28, %s1666_s29 }
  0x2e   : > { %p1674_p6 = scmp.lt.u32.totalorder %s1666_s29, %s2039_s27 }
  0x2f   : > { %p1668_p1 = pnand %p1667_p0, %p1388_p13  ;;  %p1673_p5 = por %p1672_p4, %p1671_p3 }
  0x31   : > { %p1669_p2 = pneg %p1668_p1  ;;  %p1675_p8 = por %p1674_p6, %p1673_p5 }
  0x33   : > { %p1676_p10 = pnand %p1675_p8, %p1669_p2 }
  0x35   : > { %1679 = shalt.err (!%p1676_p10)
}
  0x36   : > { %s1680_s9 = scalar_lea.vmem %s2034_s17, %s2025_s19  ;;  %s1890_s11 = smov [#allocation2]  }
  0x37   : > { %p1681_p11 = scmp.ne.s32.totalorder %s2034_s17, %s1680_s9  ;;  %s1684_s26 = sshll.u32 %s1890_s11, 4  ;;  %s1685_s26 = int_to_ptr.vmem [resolvable:$false] %s1684_s26 }
  0x38   : > { %s1686_s20 = scalar_lea.vmem %s1685_s26, 2048  ;;  %p1687_p1 = scmp.lt.s32.totalorder %s2034_s17, %s1685_s26 }
  0x39   : > { %p1682_p12 = pnand %p1681_p11, %p1388_p13  ;;  %p1688_p3 = scmp.lt.s32.totalorder %s1686_s20, %s1680_s9 }
  0x3b   : > { %p1683_p0 = pneg %p1682_p12  ;;  %p1689_p4 = por %p1688_p3, %p1687_p1 }
  0x3d   : > { %p1690_p5 = pnand %p1689_p4, %p1683_p0 }
  0x3f   : > { %1693 = shalt.err (!%p1690_p5)
}
  0x40   : > { %s1891_s29 = smov 384   ;;  %s1892_s23 = smov 256  }
  0x41   : > { %326 = dma.hbm_to_vmem [thread:$0]  (%p1388_p13), %s2039_s27, %s2025_s19, %s2034_s17, %s2028_s22, %s1891_s29, %s1892_s23, %s1390_s18  }
  0x42 PF: > { %p1393_p2 = scmp.ge.s32.totalorder %s1824_s16, 1  ;;  %p328_p6 = scmp.lt.s32.totalorder %s1824_s16, 5 }
  0x44   : > { %p329_p8 = pnand %p1393_p2, %p328_p6 }
  0x45   : > { %s2071_s28 = sand.u32 (!%p329_p8), 1, %s1800_s10  }
  0x46   : > { %332 = sbr.rel (%p329_p8) target bundleno = 1164 (0x48c), region = 56  ;;  %s1394_s24 = sshll.u32 (!%p329_p8), %s2071_s28, 6 }
  0x47   : > { %s335_s14 = scalar_lea.sflag (!%p329_p8), [#allocation3], %s2071_s28  ;;  %s338_s9 = scalar_lea.vmem (!%p329_p8), [#allocation2], %s1394_s24 }
  0x4d   : > { %1791 = dma.done.wait (%p2002_p7), %s335_s14, 1024  }
  0x4e   : > { %1793 = vsyncadd (%p2002_p7), %s335_s14, 4294966272  ;;  %v1893_v0 = vmov 0.0   ;;  %v1894_v1 = vmov 0   ;;  %v383_v2 = vld [vmem:[%s338_s9 + $0x8] sm:$0xff]  ;;  %v385_v3 = vld [vmem:[%s338_s9 + $0x18] sm:$0xff]  ;;  %vm418_vm0 = vcmask 261120  }
  0x4f   : > { %495 = vmatprep.mubr.f32.mxu0 %v1893_v0  ;;  %1660 = vset.pattern.permute.xlu0 %v1894_v1  ;;  %v382_v4 = vld [vmem:[%s338_s9] sm:$0xff]  ;;  %v1439_v5 = vpack.c.bf16 %v385_v3, %v383_v2  ;;  %v384_v6 = vld [vmem:[%s338_s9 + $0x10] sm:$0xff]  ;;  %v387_v7 = vld [vmem:[%s338_s9 + $0x28] sm:$0xff]  ;;  %vm636_vm1 = vcmask 130048   ;;  %vm720_vm2 = vcmask 64512   ;;  %s1395_s21 = sshll.u32 %s2071_s28, 3 }
  0x50   : > { %1661 = vset.pattern.permute.xlu1 %v1894_v1  ;;  %612 = vmatprep.mubr.f32.mxu1 %v1893_v0  ;;  %v389_v8 = vld [vmem:[%s338_s9 + $0x38] sm:$0xff]  ;;  %v1441_v9 = vpack.c.bf16 %v384_v6, %v382_v4  ;;  %v386_v11 = vld [vmem:[%s338_s9 + $0x20] sm:$0xff]  ;;  %v388_v12 = vld [vmem:[%s338_s9 + $0x30] sm:$0xff]  ;;  %s2142_s30 = scalar_lea.vmem [#allocation4], %s1395_s21   ;;  %s1405_s19 = sshll.u32 (%p2012_p9), %s1808_s12, 1 }
  0x51   : > { %v1443_v10 = vpack.c.bf16 %v389_v8, %v387_v7  ;;  %1440 = vmatprep.subr.bf16.mxu0 %v1439_v5  ;;  %v1445_v13 = vpack.c.bf16 %v388_v12, %v386_v11  ;;  %v394_v14 = vld [vmem:[%s2583_s2] sm:$0xff]  ;;  %v396_v15 = vld [vmem:[%s2583_s2 + $0x10] sm:$0xff]  ;;  %v395_v16 = vld [vmem:[%s2583_s2 + $0x8] sm:$0xff]  ;;  %s1460_s22 = smul.u32 (%p2012_p9), 3, %s1812_s13  ;;  %s810_s27 = ssub.s32 (%p2012_p9), 3, %s1405_s19 }
  0x52   : > { %1442 = vmatpush1.bf16.msra.mxu0 %v1441_v9  ;;  %400 = vperm.xlu0 %1660, %v394_v14   ;;  %v397_v17 = vld [vmem:[%s2583_s2 + $0x18] sm:$0xff]  ;;  %v390_v18 = vld [vmem:[%s2582_s1] sm:$0xff]  ;;  %v531_v20 = vld [vmem:[%s2585_s4 + $0x8] sm:$0xff]  ;;  %p811_p7 = scmp.lt.s32.totalorder (%p2012_p9), %s810_s27, 2  ;;  %s2603_s29 = sld [smem:[#allocation11_spill]] (%p2012_p9) }
  0x53   : > { %1444 = vmatprep.subr.bf16.mxu0 %v1443_v10  ;;  %410 = vperm.xlu1 %1661, %v396_v15   ;;  %v530_v19 = vld [vmem:[%s2585_s4] sm:$0xff]  ;;  %v391_v21 = vld [vmem:[%s2582_s1 + $0x8] sm:$0xff]  ;;  %v392_v24 = vld [vmem:[%s2582_s1 + $0x10] sm:$0xff]  ;;  %s816_s11 = sadd.s32 (%p2012_p9), %s1460_s22, %s1405_s19 }
  0x54   : > { %v630_v22 = vld [vmem:[%s2587_s6] sm:$0xff]  ;;  %v393_v25 = vld [vmem:[%s2582_s1 + $0x18] sm:$0xff]  ;;  %v529_v59 = vld [vmem:[%s2584_s3 + $0x8] sm:$0xff]  ;;  %s1408_s26 = sshll.u32 (%p2012_p9), %s816_s11, 2 }
  0x55   : > { %v714_v23 = vld [vmem:[%s2589_s8] sm:$0x7] }
  0x56   : > { %1446 = vmatpush1.bf16.msra.mxu0 %v1445_v13  ;;  %405 = vperm.xlu0 %1660, %v395_v16   ;;  %v528_v58 = vld [vmem:[%s2584_s3] sm:$0xff] }
  0x57   : > { %415 = vperm.xlu1 %1661, %v397_v17   ;;  %v629_v13 = vld [vmem:[%s2586_s5] sm:$0xff] }
  0x58   : > { %s2152_s23 = scalar_lea.vmem (%p2012_p9), %s2603_s29, %s1408_s26  }
  0x59   : > { %1396 = vmatmul.mubr.msk.f32.vlgmr.msra.gmra.mrb[0].mxu0 %vm418_vm0, %v390_v18 }
  0x5a   : > { %501 = vmatprep.mubr.f32.mxu0 %v1893_v0  ;;  %534 = vperm.xlu0 %1660, %v530_v19  }
  0x5b   : > { %539 = vperm.xlu1 %1661, %v531_v20  }
  0x5d   : > { %1397 = vmatmul.mubr.msk.f32.gmra.mrb[2].mxu0 %vm418_vm0, %v391_v21  ;;  %v713_v21 = vld [vmem:[%s2588_s7] sm:$0x7] }
  0x5e   : > { %507 = vmatprep.mubr.f32.mxu0 %v1893_v0  ;;  %633 = vperm.xlu0 %1660, %v630_v22  }
  0x5f   : > { %717 = vperm.xlu1 %1661, %v714_v23  }
  0x61   : > { %1398 = vmatmul.mubr.msk.f32.gmra.mrb[4].mxu0 %vm418_vm0, %v392_v24 }
  0x62   : > { %513 = vmatprep.mubr.f32.mxu0 %v1893_v0 }
  0x65   : > { %1399 = vmatmul.mubr.msk.f32.gmra.mrb[6].mxu0 %vm418_vm0, %v393_v25 }
  0xd1   : > { %v401_v26 = vpop.permute.xlu0 %400 }
  0xd2   : > { %v411_v35 = vpop.permute.xlu1 %410 }
  0xd5   : > { %v406_v30 = vpop.permute.xlu0 %405 }
  0xd6   : > { %v416_v46 = vpop.permute.xlu1 %415 }
  0xd9   : > { %v535_v62 = vpop.permute.xlu0 %534 }
  0xda   : > { %v540_v1 = vpop.permute.xlu1 %539 }
  0xdd   : > { %v634_v14 = vpop.permute.xlu0 %633 }
  0xde   : > { %v718_v22 = vpop.permute.xlu1 %717 }
 0x12c   : > { %v497_v27 = vpop.f32.mrb[0].mxu0 }
 0x12d   : > { %v499_v28 = vpop.f32.mrb[1].mxu0  ;;  %v498_v29 = vadd.f32 %v497_v27, %v401_v26 }
 0x12e   : > { %v500_v31 = vadd.f32 %v499_v28, %v401_v26 }
 0x12f   : > { %v520_v37 = vmax.f32 %v498_v29, 0.0 }
 0x130   : > { %v503_v32 = vpop.f32.mrb[2].mxu0  ;;  %v521_v39 = vmax.f32 %v500_v31, 0.0 }
 0x131   : > { %v504_v33 = vadd.f32 %v503_v32, %v406_v30  ;;  %v505_v34 = vpop.f32.mrb[3].mxu0 }
 0x132   : > { %v506_v36 = vadd.f32 %v505_v34, %v406_v30 }
 0x133   : > { %v522_v38 = vmax.f32 %v504_v33, 0.0 }
 0x134   : > { %v523_v40 = vmax.f32 %v506_v36, 0.0  ;;  %v509_v41 = vpop.f32.mrb[4].mxu0 }
 0x135   : > { %v511_v42 = vpop.f32.mrb[5].mxu0  ;;  %v1449_v43 = vpack.c.bf16 %v522_v38, %v520_v37  ;;  %v510_v45 = vadd.f32 %v509_v41, %v411_v35 }
 0x136   : > { %v1447_v44 = vpack.c.bf16 %v523_v40, %v521_v39  ;;  %v512_v47 = vadd.f32 %v511_v42, %v411_v35 }
 0x137   : > { %v524_v52 = vmax.f32 %v510_v45, 0.0 }
 0x138   : > { %v515_v48 = vpop.f32.mrb[6].mxu0  ;;  %1448 = vmatprep.subr.bf16.mxu1 %v1447_v44  ;;  %v525_v54 = vmax.f32 %v512_v47, 0.0 }
 0x139   : > { %v516_v49 = vadd.f32 %v515_v48, %v416_v46  ;;  %v517_v50 = vpop.f32.mrb[7].mxu0  ;;  %1450 = vmatpush1.bf16.msra.mxu1 %v1449_v43 }
 0x13a   : > { %v518_v51 = vadd.f32 %v517_v50, %v416_v46 }
 0x13b   : > { %v526_v53 = vmax.f32 %v516_v49, 0.0 }
 0x13c   : > { %v527_v55 = vmax.f32 %v518_v51, 0.0 }
 0x13d   : > { %v1453_v56 = vpack.c.bf16 %v526_v53, %v524_v52 }
 0x13e   : > { %v1451_v57 = vpack.c.bf16 %v527_v55, %v525_v54 }
 0x140   : > { %1452 = vmatprep.subr.bf16.mxu1 %v1451_v57 }
 0x141   : > { %1454 = vmatpush1.bf16.msra.mxu1 %v1453_v56 }
 0x144   : > { %1400 = vmatmul.mubr.msk.f32.vlgmr.msra.gmra.mrb[0].mxu1 %vm418_vm0, %v528_v58 }
 0x145   : > { %618 = vmatprep.mubr.f32.mxu1 %v1893_v0 }
 0x148   : > { %1401 = vmatmul.mubr.msk.f32.gmra.mrb[2].mxu1 %vm418_vm0, %v529_v59 }
 0x149   : > { %704 = vmatprep.mubr.f32.mxu1 %v1893_v0 }
 0x217   : > { %v614_v60 = vpop.f32.mrb[0].mxu1 }
 0x218   : > { %v616_v61 = vpop.f32.mrb[1].mxu1  ;;  %v615_v63 = vadd.f32 %v614_v60, %v535_v62 }
 0x219   : > { %v617_v2 = vadd.f32 %v616_v61, %v535_v62 }
 0x21a   : > { %v625_v7 = vmax.f32 %v615_v63, 0.0 }
 0x21b   : > { %v620_v3 = vpop.f32.mrb[2].mxu1  ;;  %v626_v9 = vmax.f32 %v617_v2, 0.0 }
 0x21c   : > { %v621_v4 = vadd.f32 %v620_v3, %v540_v1  ;;  %v622_v5 = vpop.f32.mrb[3].mxu1 }
 0x21d   : > { %v623_v6 = vadd.f32 %v622_v5, %v540_v1 }
 0x21e   : > { %v627_v8 = vmax.f32 %v621_v4, 0.0 }
 0x21f   : > { %v628_v10 = vmax.f32 %v623_v6, 0.0 }
 0x220   : > { %v1457_v11 = vpack.c.bf16 %v627_v8, %v625_v7 }
 0x221   : > { %v1455_v12 = vpack.c.bf16 %v628_v10, %v626_v9 }
 0x223   : > { %1456 = vmatprep.subr.bf16.mxu1 %v1455_v12 }
 0x224   : > { %1458 = vmatpush1.bf16.msra.mxu1 %v1457_v11 }
 0x227   : > { %1402 = vmatmul.mubr.msk.f32.vlgmr.msra.gmra.mrb[4].mxu1 %vm636_vm1, %v629_v13 }
 0x228   : > { %788 = vmatprep.mubr.f32.mxu1 %v1893_v0 }
 0x2fa   : > { %v706_v15 = vpop.f32.mrb[4].mxu1 }
 0x2fb   : > { %v707_v16 = vadd.f32 %v706_v15, %v634_v14  ;;  %v708_v17 = vpop.f32.mrb[5].mxu1 }
 0x2fc   : > { %v709_v18 = vadd.f32 %v708_v17, %v634_v14 }
 0x2fd   : > { %v711_v20 = vmax.f32 %v707_v16, 0.0 }
 0x2fe   : > { %v712_v19 = vmax.f32 %v709_v18, 0.0 }
 0x300   : > { %724 = vmatprep.subr.mxu1 %v712_v19 }
 0x301   : > { %725 = vmatpush1.msra.mxu1 %v711_v20 }
 0x302   : > { %1403 = vmatmul.mubr.msk.f32.vlgmr.msra.gmra.mrb[6].mxu1 %vm720_vm2, %v713_v21 }
 0x3d5   : > { %v790_v23 = vpop.f32.mrb[6].mxu1 }
 0x3d6   : > { %v791_v24 = vadd.f32 %v790_v23, %v718_v22  ;;  %v792_v0 = vpop.f32.mrb[7].mxu1 }
 0x3d7   : > { %v793_v25 = vadd.f32 %v792_v0, %v718_v22 }
 0x3d8   : > { %1662 = vtanh.f32 %v791_v24 }
 0x3d9   : > { %1664 = vtanh.f32 %v793_v25 }
 0x3e0   : > { %808 = sbr.rel (!%p2012_p9) target bundleno = 1164 (0x48c), region = 64 }
 0x3e2   : > { %v1663_v26 = vpop.eup %1662 }
 0x3e3   : > { %v1665_v27 = vpop.eup %1664 }
 0x3e4   : > { %v799_v28 = vcombine.low %v1663_v26, %v1665_v27 }
 0x3e6   : > { %801 = vst [vmem:[%s2142_s30] sm:$0x77] %v799_v28 }
 0x3e7   : > { %s2635_s27 = smov (!%p811_p7, %s810_s27), 2 }
 0x3e8   : > { %s1406_s24 = sshll.u32 %s2635_s27, 6  ;;  %s2154_s14 = sshll.u32 %s2635_s27, 2 }
 0x3e9   : > { %p1410_p13 = scmp.eq.s32.totalorder %s1406_s24, 0 }
 0x3ea   : > { %p823_p9 = scmp.lt.u32.totalorder (!%p1410_p13), %s2154_s14, 8 }
 0x3eb   : > { %822 = sbr.rel (%p1410_p13) target bundleno = 1164 (0x48c), region = 68 }
 0x3f2   : > { %826 = sbr.rel (%p823_p9) target bundleno = 1155 (0x483), region = 72  ;;  %s2158_s12 = sand.u32 (!%p823_p9), 7, %s2154_s14  }
 0x3f3   : > { %p842_p10 = scmp.eq.s32.totalorder (!%p823_p9), %s2158_s12, 0  ;;  %p1411_p11 = scmp.ne.s32.totalorder (!%p823_p9), %s2158_s12, 0 }
 0x3f9   : > { %845 = sbr.rel (%p1411_p11) target bundleno = 1084 (0x43c), region = 87  ;;  %s846_s13 = sshrl.u32 (!%p1411_p11), %s2154_s14, 3 }
 0x3fa   : > { %s2165_s25 = sshrl.u32 (!%p1411_p11), %s846_s13, 6 }
 0x3fb   : > { %p1412_p12 = scmp.le.s32.totalorder (!%p1411_p11), %s2165_s25, 0 }
 0x400   : > { %1295 = sbr.rel (%p1412_p12) target bundleno = 1064 (0x428), region = 174  ;;  %s2604_s9 = smov (!%p1412_p12), %s2152_s23 }
 0x401   : > { %s2605_s17 = smov (!%p1412_p12), %s2142_s30  ;;  %s2174_s18 = smov (!%p1412_p12), 0  }
 0x402   : > { %s2176_s21 = smov (!%p1412_p12), 0  }
 0x407 LB: >> { %v859_v29 = vld [vmem:[%s1832_s17] sm:$0xff]  ;;  %v861_v30 = vld [vmem:[%s1832_s17 + $0x8] sm:$0xff]  ;;  %v863_v31 = vld [vmem:[%s1832_s17 + $0x10] sm:$0xff]  ;;  %s987_s19 = sadd.s32 1, %s1836_s18  ;;  %s853_s21 = sadd.s32 1, %s1840_s21   ;;  %s1840_s21 = sphi %s2176_s21, %s853_s21   ;;  %s1836_s18 = sphi %s2174_s18, %s2608_s18   ;;  %s1832_s17 = sphi %s2605_s17, %s2607_s17   ;;  %s1828_s9 = sphi %s2604_s9, %s2606_s9  }
 0x408   : >> { %860 = vst [vmem:[%s1828_s9] sm:$0xff] %v859_v29  ;;  %862 = vst [vmem:[%s1828_s9 + $0x8] sm:$0xff] %v861_v30  ;;  %v865_v32 = vld [vmem:[%s1832_s17 + $0x18] sm:$0xff]  ;;  %v867_v33 = vld [vmem:[%s1832_s17 + $0x20] sm:$0xff]  ;;  %p988_p0 = scmp.ge.s32.totalorder %s987_s19, %s2165_s25  ;;  %p852_p1 = scmp.ge.s32.totalorder %s853_s21, %s2165_s25 }
 0x409   : >> { %864 = vst [vmem:[%s1828_s9 + $0x10] sm:$0xff] %v863_v31  ;;  %v869_v34 = vld [vmem:[%s1832_s17 + $0x28] sm:$0xff]  ;;  %866 = vst [vmem:[%s1828_s9 + $0x18] sm:$0xff] %v865_v32  ;;  %v871_v35 = vld [vmem:[%s1832_s17 + $0x30] sm:$0xff] }
 0x40a   : >> { %868 = vst [vmem:[%s1828_s9 + $0x20] sm:$0xff] %v867_v33  ;;  %870 = vst [vmem:[%s1828_s9 + $0x28] sm:$0xff] %v869_v34  ;;  %v873_v36 = vld [vmem:[%s1832_s17 + $0x38] sm:$0xff]  ;;  %v875_v37 = vld [vmem:[%s1832_s17 + $0x40] sm:$0xff]  ;;  %s2637_s19 = smov (%p988_p0, %s987_s19), 0 }
 0x40b   : >> { %872 = vst [vmem:[%s1828_s9 + $0x30] sm:$0xff] %v871_v35  ;;  %874 = vst [vmem:[%s1828_s9 + $0x38] sm:$0xff] %v873_v36  ;;  %v877_v38 = vld [vmem:[%s1832_s17 + $0x48] sm:$0xff]  ;;  %v879_v39 = vld [vmem:[%s1832_s17 + $0x50] sm:$0xff]  ;;  %s1413_s22 = sshll.u32 %s2637_s19, 9  ;;  %s2608_s18 = smov %s2637_s19 }
 0x40c   : >> { %876 = vst [vmem:[%s1828_s9 + $0x40] sm:$0xff] %v875_v37  ;;  %v881_v40 = vld [vmem:[%s1832_s17 + $0x58] sm:$0xff]  ;;  %878 = vst [vmem:[%s1828_s9 + $0x48] sm:$0xff] %v877_v38  ;;  %v883_v41 = vld [vmem:[%s1832_s17 + $0x60] sm:$0xff]  ;;  %s2232_s27 = scalar_lea.vmem %s2142_s30, %s1413_s22 [#allocation4]   ;;  %s2235_s11 = scalar_lea.vmem %s2152_s23, %s1413_s22  }
 0x40d   : >> { %880 = vst [vmem:[%s1828_s9 + $0x50] sm:$0xff] %v879_v39  ;;  %882 = vst [vmem:[%s1828_s9 + $0x58] sm:$0xff] %v881_v40  ;;  %v885_v42 = vld [vmem:[%s1832_s17 + $0x68] sm:$0xff]  ;;  %v887_v43 = vld [vmem:[%s1832_s17 + $0x70] sm:$0xff] }
 0x40e   : >> { %884 = vst [vmem:[%s1828_s9 + $0x60] sm:$0xff] %v883_v41  ;;  %886 = vst [vmem:[%s1828_s9 + $0x68] sm:$0xff] %v885_v42  ;;  %v889_v44 = vld [vmem:[%s1832_s17 + $0x78] sm:$0xff]  ;;  %v891_v45 = vld [vmem:[%s1832_s17 + $0x80] sm:$0xff] }
 0x40f   : >> { %888 = vst [vmem:[%s1828_s9 + $0x70] sm:$0xff] %v887_v43  ;;  %v893_v46 = vld [vmem:[%s1832_s17 + $0x88] sm:$0xff]  ;;  %890 = vst [vmem:[%s1828_s9 + $0x78] sm:$0xff] %v889_v44  ;;  %v895_v47 = vld [vmem:[%s1832_s17 + $0x90] sm:$0xff] }
 0x410   : >> { %892 = vst [vmem:[%s1828_s9 + $0x80] sm:$0xff] %v891_v45  ;;  %894 = vst [vmem:[%s1828_s9 + $0x88] sm:$0xff] %v893_v46  ;;  %v897_v48 = vld [vmem:[%s1832_s17 + $0x98] sm:$0xff]  ;;  %v899_v49 = vld [vmem:[%s1832_s17 + $0xa0] sm:$0xff] }
 0x411   : >> { %896 = vst [vmem:[%s1828_s9 + $0x90] sm:$0xff] %v895_v47  ;;  %898 = vst [vmem:[%s1828_s9 + $0x98] sm:$0xff] %v897_v48  ;;  %v901_v50 = vld [vmem:[%s1832_s17 + $0xa8] sm:$0xff]  ;;  %v903_v51 = vld [vmem:[%s1832_s17 + $0xb0] sm:$0xff] }
 0x412   : >> { %900 = vst [vmem:[%s1828_s9 + $0xa0] sm:$0xff] %v899_v49  ;;  %v905_v52 = vld [vmem:[%s1832_s17 + $0xb8] sm:$0xff]  ;;  %902 = vst [vmem:[%s1828_s9 + $0xa8] sm:$0xff] %v901_v50  ;;  %v907_v53 = vld [vmem:[%s1832_s17 + $0xc0] sm:$0xff] }
 0x413   : >> { %904 = vst [vmem:[%s1828_s9 + $0xb0] sm:$0xff] %v903_v51  ;;  %906 = vst [vmem:[%s1828_s9 + $0xb8] sm:$0xff] %v905_v52  ;;  %v909_v54 = vld [vmem:[%s1832_s17 + $0xc8] sm:$0xff]  ;;  %v911_v55 = vld [vmem:[%s1832_s17 + $0xd0] sm:$0xff] }
 0x414   : >> { %908 = vst [vmem:[%s1828_s9 + $0xc0] sm:$0xff] %v907_v53  ;;  %910 = vst [vmem:[%s1828_s9 + $0xc8] sm:$0xff] %v909_v54  ;;  %v913_v56 = vld [vmem:[%s1832_s17 + $0xd8] sm:$0xff]  ;;  %v915_v57 = vld [vmem:[%s1832_s17 + $0xe0] sm:$0xff] }
 0x415   : >> { %912 = vst [vmem:[%s1828_s9 + $0xd0] sm:$0xff] %v911_v55  ;;  %v917_v58 = vld [vmem:[%s1832_s17 + $0xe8] sm:$0xff]  ;;  %914 = vst [vmem:[%s1828_s9 + $0xd8] sm:$0xff] %v913_v56  ;;  %v919_v59 = vld [vmem:[%s1832_s17 + $0xf0] sm:$0xff] }
 0x416   : >> { %916 = vst [vmem:[%s1828_s9 + $0xe0] sm:$0xff] %v915_v57  ;;  %918 = vst [vmem:[%s1828_s9 + $0xe8] sm:$0xff] %v917_v58  ;;  %v921_v60 = vld [vmem:[%s1832_s17 + $0xf8] sm:$0xff]  ;;  %v923_v61 = vld [vmem:[%s1832_s17 + $0x100] sm:$0xff] }
 0x417   : >> { %920 = vst [vmem:[%s1828_s9 + $0xf0] sm:$0xff] %v919_v59  ;;  %922 = vst [vmem:[%s1828_s9 + $0xf8] sm:$0xff] %v921_v60  ;;  %v925_v62 = vld [vmem:[%s1832_s17 + $0x108] sm:$0xff]  ;;  %v927_v63 = vld [vmem:[%s1832_s17 + $0x110] sm:$0xff] }
 0x418   : >> { %924 = vst [vmem:[%s1828_s9 + $0x100] sm:$0xff] %v923_v61  ;;  %v929_v1 = vld [vmem:[%s1832_s17 + $0x118] sm:$0xff]  ;;  %926 = vst [vmem:[%s1828_s9 + $0x108] sm:$0xff] %v925_v62  ;;  %v931_v2 = vld [vmem:[%s1832_s17 + $0x120] sm:$0xff] }
 0x419   : >> { %928 = vst [vmem:[%s1828_s9 + $0x110] sm:$0xff] %v927_v63  ;;  %930 = vst [vmem:[%s1828_s9 + $0x118] sm:$0xff] %v929_v1  ;;  %v933_v3 = vld [vmem:[%s1832_s17 + $0x128] sm:$0xff]  ;;  %v935_v4 = vld [vmem:[%s1832_s17 + $0x130] sm:$0xff] }
 0x41a   : >> { %932 = vst [vmem:[%s1828_s9 + $0x120] sm:$0xff] %v931_v2  ;;  %934 = vst [vmem:[%s1828_s9 + $0x128] sm:$0xff] %v933_v3  ;;  %v937_v5 = vld [vmem:[%s1832_s17 + $0x138] sm:$0xff]  ;;  %v939_v6 = vld [vmem:[%s1832_s17 + $0x140] sm:$0xff] }
 0x41b   : >> { %936 = vst [vmem:[%s1828_s9 + $0x130] sm:$0xff] %v935_v4  ;;  %v941_v7 = vld [vmem:[%s1832_s17 + $0x148] sm:$0xff]  ;;  %938 = vst [vmem:[%s1828_s9 + $0x138] sm:$0xff] %v937_v5  ;;  %v943_v8 = vld [vmem:[%s1832_s17 + $0x150] sm:$0xff] }
 0x41c   : >> { %940 = vst [vmem:[%s1828_s9 + $0x140] sm:$0xff] %v939_v6  ;;  %942 = vst [vmem:[%s1828_s9 + $0x148] sm:$0xff] %v941_v7  ;;  %v945_v9 = vld [vmem:[%s1832_s17 + $0x158] sm:$0xff]  ;;  %v947_v10 = vld [vmem:[%s1832_s17 + $0x160] sm:$0xff] }
 0x41d   : >> { %944 = vst [vmem:[%s1828_s9 + $0x150] sm:$0xff] %v943_v8  ;;  %946 = vst [vmem:[%s1828_s9 + $0x158] sm:$0xff] %v945_v9  ;;  %v949_v11 = vld [vmem:[%s1832_s17 + $0x168] sm:$0xff]  ;;  %v951_v12 = vld [vmem:[%s1832_s17 + $0x170] sm:$0xff] }
 0x41e   : >> { %948 = vst [vmem:[%s1828_s9 + $0x160] sm:$0xff] %v947_v10  ;;  %v953_v13 = vld [vmem:[%s1832_s17 + $0x178] sm:$0xff]  ;;  %950 = vst [vmem:[%s1828_s9 + $0x168] sm:$0xff] %v949_v11  ;;  %v955_v14 = vld [vmem:[%s1832_s17 + $0x180] sm:$0xff] }
 0x41f   : >> { %952 = vst [vmem:[%s1828_s9 + $0x170] sm:$0xff] %v951_v12  ;;  %954 = vst [vmem:[%s1828_s9 + $0x178] sm:$0xff] %v953_v13  ;;  %v957_v15 = vld [vmem:[%s1832_s17 + $0x188] sm:$0xff]  ;;  %v959_v16 = vld [vmem:[%s1832_s17 + $0x190] sm:$0xff] }
 0x420   : >> { %956 = vst [vmem:[%s1828_s9 + $0x180] sm:$0xff] %v955_v14  ;;  %958 = vst [vmem:[%s1828_s9 + $0x188] sm:$0xff] %v957_v15  ;;  %v961_v17 = vld [vmem:[%s1832_s17 + $0x198] sm:$0xff]  ;;  %v963_v18 = vld [vmem:[%s1832_s17 + $0x1a0] sm:$0xff] }
 0x421   : >> { %960 = vst [vmem:[%s1828_s9 + $0x190] sm:$0xff] %v959_v16  ;;  %v965_v19 = vld [vmem:[%s1832_s17 + $0x1a8] sm:$0xff]  ;;  %962 = vst [vmem:[%s1828_s9 + $0x198] sm:$0xff] %v961_v17  ;;  %v967_v20 = vld [vmem:[%s1832_s17 + $0x1b0] sm:$0xff]  ;;  %855 = sbr.rel (!%p852_p1) target bundleno = 1031 (0x407), region = 180 }
 0x422   : >> { %964 = vst [vmem:[%s1828_s9 + $0x1a0] sm:$0xff] %v963_v18  ;;  %966 = vst [vmem:[%s1828_s9 + $0x1a8] sm:$0xff] %v965_v19  ;;  %v969_v21 = vld [vmem:[%s1832_s17 + $0x1b8] sm:$0xff]  ;;  %v971_v22 = vld [vmem:[%s1832_s17 + $0x1c0] sm:$0xff] }
 0x423   : >> { %968 = vst [vmem:[%s1828_s9 + $0x1b0] sm:$0xff] %v967_v20  ;;  %970 = vst [vmem:[%s1828_s9 + $0x1b8] sm:$0xff] %v969_v21  ;;  %v973_v23 = vld [vmem:[%s1832_s17 + $0x1c8] sm:$0xff]  ;;  %v975_v24 = vld [vmem:[%s1832_s17 + $0x1d0] sm:$0xff] }
 0x424   : >> { %972 = vst [vmem:[%s1828_s9 + $0x1c0] sm:$0xff] %v971_v22  ;;  %v977_v0 = vld [vmem:[%s1832_s17 + $0x1d8] sm:$0xff]  ;;  %974 = vst [vmem:[%s1828_s9 + $0x1c8] sm:$0xff] %v973_v23  ;;  %v979_v25 = vld [vmem:[%s1832_s17 + $0x1e0] sm:$0xff] }
 0x425   : >> { %976 = vst [vmem:[%s1828_s9 + $0x1d0] sm:$0xff] %v975_v24  ;;  %978 = vst [vmem:[%s1828_s9 + $0x1d8] sm:$0xff] %v977_v0  ;;  %v981_v26 = vld [vmem:[%s1832_s17 + $0x1e8] sm:$0xff]  ;;  %v983_v27 = vld [vmem:[%s1832_s17 + $0x1f0] sm:$0xff] }
 0x426   : >> { %980 = vst [vmem:[%s1828_s9 + $0x1e0] sm:$0xff] %v979_v25  ;;  %982 = vst [vmem:[%s1828_s9 + $0x1e8] sm:$0xff] %v981_v26  ;;  %v985_v28 = vld [vmem:[%s1832_s17 + $0x1f8] sm:$0xff]  ;;  %s2607_s17 = smov %s2232_s27 }
 0x427   : >> { %984 = vst [vmem:[%s1828_s9 + $0x1f0] sm:$0xff] %v983_v27  ;;  %986 = vst [vmem:[%s1828_s9 + $0x1f8] sm:$0xff] %v985_v28  ;;  %s2606_s9 = smov %s2235_s11 }
 0x428 PF: > { %s2341_s26 = sand.u32 63, %s846_s13   ;;  %s1435_s28 = sshll.u32 %s2165_s25, 13 }
 0x429   : > { %s998_s20 = sshra.s32 %s1435_s28, 4  ;;  %p1418_p3 = scmp.le.s32.totalorder %s2341_s26, 0 }
 0x42a   : > { %s999_s29 = scalar_lea.vmem %s2142_s30, %s998_s20 [#allocation4]   ;;  %s1002_s24 = scalar_lea.vmem %s2152_s23, %s998_s20  }
 0x42b   : > { %1309 = sbr.rel (%p1418_p3) target bundleno = 1084 (0x43c), region = 185  ;;  %s1842_s22 = smov (!%p1418_p3), %s1002_s24  }
 0x42c   : > { %s1846_s19 = smov (!%p1418_p3), %s999_s29   ;;  %s1850_s27 = smov (!%p1418_p3), 0  }
 0x42d   : > { %s1854_s21 = smov (!%p1418_p3), 0  }
 0x432 LB: >> { %v1014_v29 = vld [vmem:[%s1848_s19] sm:$0xff]  ;;  %s1016_s13 = sadd.s32 1, %s1852_s27  ;;  %s1008_s21 = sadd.s32 1, %s1856_s21   ;;  %s1856_s21 = sphi %s1854_s21, %s1008_s21   ;;  %s1852_s27 = sphi %s1850_s27, %s1851_s27   ;;  %s1848_s19 = sphi %s1846_s19, %s1021_s19   ;;  %s1844_s22 = sphi %s1842_s22, %s1022_s22  }
 0x433   : >> { %1015 = vst [vmem:[%s1844_s22] sm:$0xff] %v1014_v29  ;;  %p1017_p4 = scmp.ge.s32.totalorder %s1016_s13, %s2341_s26  ;;  %p1007_p5 = scmp.ge.s32.totalorder %s1008_s21, %s2341_s26 }
 0x435   : >> { %s2639_s13 = smov (%p1017_p4, %s1016_s13), 0  ;;  %1010 = sbr.rel (!%p1007_p5) target bundleno = 1074 (0x432), region = 191 }
 0x436   : >> { %s1419_s25 = sshll.u32 %s2639_s13, 3  ;;  %s1851_s27 = smov %s2639_s13  }
 0x437   : >> { %s1021_s19 = scalar_lea.vmem %s999_s29, %s1419_s25 [#allocation4]   ;;  %s1022_s22 = scalar_lea.vmem %s1002_s24, %s1419_s25  }
 0x43c PF: > { %1025 = sbr.rel (%p842_p10) target bundleno = 1155 (0x483), region = 105  ;;  %s2353_s9 = ssub.s32 (!%p842_p10), %s2154_s14, %s2158_s12 }
 0x43d   : > { %s1031_s17 = sshrl.u32 (!%p842_p10), %s2154_s14, 3 }
 0x43e   : > { %s2362_s28 = sshrl.u32 (!%p842_p10), %s1031_s17, 6 }
 0x43f   : > { %p1421_p2 = scmp.le.s32.totalorder (!%p842_p10), %s2362_s28, 0 }
 0x443   : > { %1323 = sbr.rel (%p1421_p2) target bundleno = 1131 (0x46b), region = 196  ;;  %s2609_s26 = smov (!%p1421_p2), %s2152_s23 }
 0x444   : > { %s2610_s20 = smov (!%p1421_p2), %s2142_s30  ;;  %s2371_s29 = smov (!%p1421_p2), 0  }
 0x445   : > { %s2373_s24 = smov (!%p1421_p2), 0  }
 0x44a LB: >> { %v1044_v30 = vld [vmem:[%s1864_s20] sm:$0xff]  ;;  %v1046_v31 = vld [vmem:[%s1864_s20 + $0x8] sm:$0xff]  ;;  %v1048_v32 = vld [vmem:[%s1864_s20 + $0x10] sm:$0xff]  ;;  %s1172_s22 = sadd.s32 1, %s1868_s29  ;;  %s1038_s24 = sadd.s32 1, %s1872_s24   ;;  %s1872_s24 = sphi %s2373_s24, %s1038_s24   ;;  %s1868_s29 = sphi %s2371_s29, %s2613_s29   ;;  %s1864_s20 = sphi %s2610_s20, %s2612_s20   ;;  %s1860_s26 = sphi %s2609_s26, %s2611_s26  }
 0x44b   : >> { %1045 = vst [vmem:[%s1860_s26] sm:$0xff] %v1044_v30  ;;  %1047 = vst [vmem:[%s1860_s26 + $0x8] sm:$0xff] %v1046_v31  ;;  %v1050_v33 = vld [vmem:[%s1864_s20 + $0x18] sm:$0xff]  ;;  %v1052_v34 = vld [vmem:[%s1864_s20 + $0x20] sm:$0xff]  ;;  %p1173_p6 = scmp.ge.s32.totalorder %s1172_s22, %s2362_s28  ;;  %p1037_p8 = scmp.ge.s32.totalorder %s1038_s24, %s2362_s28 }
 0x44c   : >> { %1049 = vst [vmem:[%s1860_s26 + $0x10] sm:$0xff] %v1048_v32  ;;  %v1054_v35 = vld [vmem:[%s1864_s20 + $0x28] sm:$0xff]  ;;  %1051 = vst [vmem:[%s1860_s26 + $0x18] sm:$0xff] %v1050_v33  ;;  %v1056_v36 = vld [vmem:[%s1864_s20 + $0x30] sm:$0xff] }
 0x44d   : >> { %1053 = vst [vmem:[%s1860_s26 + $0x20] sm:$0xff] %v1052_v34  ;;  %1055 = vst [vmem:[%s1860_s26 + $0x28] sm:$0xff] %v1054_v35  ;;  %v1058_v37 = vld [vmem:[%s1864_s20 + $0x38] sm:$0xff]  ;;  %v1060_v38 = vld [vmem:[%s1864_s20 + $0x40] sm:$0xff]  ;;  %s2641_s22 = smov (%p1173_p6, %s1172_s22), 0 }
 0x44e   : >> { %1057 = vst [vmem:[%s1860_s26 + $0x30] sm:$0xff] %v1056_v36  ;;  %1059 = vst [vmem:[%s1860_s26 + $0x38] sm:$0xff] %v1058_v37  ;;  %v1062_v39 = vld [vmem:[%s1864_s20 + $0x48] sm:$0xff]  ;;  %v1064_v40 = vld [vmem:[%s1864_s20 + $0x50] sm:$0xff]  ;;  %s1422_s19 = sshll.u32 %s2641_s22, 9  ;;  %s2613_s29 = smov %s2641_s22 }
 0x44f   : >> { %1061 = vst [vmem:[%s1860_s26 + $0x40] sm:$0xff] %v1060_v38  ;;  %v1066_v41 = vld [vmem:[%s1864_s20 + $0x58] sm:$0xff]  ;;  %1063 = vst [vmem:[%s1860_s26 + $0x48] sm:$0xff] %v1062_v39  ;;  %v1068_v42 = vld [vmem:[%s1864_s20 + $0x60] sm:$0xff]  ;;  %s2429_s27 = scalar_lea.vmem %s2142_s30, %s1422_s19 [#allocation4]   ;;  %s2432_s21 = scalar_lea.vmem %s2152_s23, %s1422_s19  }
 0x450   : >> { %1065 = vst [vmem:[%s1860_s26 + $0x50] sm:$0xff] %v1064_v40  ;;  %1067 = vst [vmem:[%s1860_s26 + $0x58] sm:$0xff] %v1066_v41  ;;  %v1070_v43 = vld [vmem:[%s1864_s20 + $0x68] sm:$0xff]  ;;  %v1072_v44 = vld [vmem:[%s1864_s20 + $0x70] sm:$0xff] }
 0x451   : >> { %1069 = vst [vmem:[%s1860_s26 + $0x60] sm:$0xff] %v1068_v42  ;;  %1071 = vst [vmem:[%s1860_s26 + $0x68] sm:$0xff] %v1070_v43  ;;  %v1074_v45 = vld [vmem:[%s1864_s20 + $0x78] sm:$0xff]  ;;  %v1076_v46 = vld [vmem:[%s1864_s20 + $0x80] sm:$0xff] }
 0x452   : >> { %1073 = vst [vmem:[%s1860_s26 + $0x70] sm:$0xff] %v1072_v44  ;;  %v1078_v47 = vld [vmem:[%s1864_s20 + $0x88] sm:$0xff]  ;;  %1075 = vst [vmem:[%s1860_s26 + $0x78] sm:$0xff] %v1074_v45  ;;  %v1080_v48 = vld [vmem:[%s1864_s20 + $0x90] sm:$0xff] }
 0x453   : >> { %1077 = vst [vmem:[%s1860_s26 + $0x80] sm:$0xff] %v1076_v46  ;;  %1079 = vst [vmem:[%s1860_s26 + $0x88] sm:$0xff] %v1078_v47  ;;  %v1082_v49 = vld [vmem:[%s1864_s20 + $0x98] sm:$0xff]  ;;  %v1084_v50 = vld [vmem:[%s1864_s20 + $0xa0] sm:$0xff] }
 0x454   : >> { %1081 = vst [vmem:[%s1860_s26 + $0x90] sm:$0xff] %v1080_v48  ;;  %1083 = vst [vmem:[%s1860_s26 + $0x98] sm:$0xff] %v1082_v49  ;;  %v1086_v51 = vld [vmem:[%s1864_s20 + $0xa8] sm:$0xff]  ;;  %v1088_v52 = vld [vmem:[%s1864_s20 + $0xb0] sm:$0xff] }
 0x455   : >> { %1085 = vst [vmem:[%s1860_s26 + $0xa0] sm:$0xff] %v1084_v50  ;;  %v1090_v53 = vld [vmem:[%s1864_s20 + $0xb8] sm:$0xff]  ;;  %1087 = vst [vmem:[%s1860_s26 + $0xa8] sm:$0xff] %v1086_v51  ;;  %v1092_v54 = vld [vmem:[%s1864_s20 + $0xc0] sm:$0xff] }
 0x456   : >> { %1089 = vst [vmem:[%s1860_s26 + $0xb0] sm:$0xff] %v1088_v52  ;;  %1091 = vst [vmem:[%s1860_s26 + $0xb8] sm:$0xff] %v1090_v53  ;;  %v1094_v55 = vld [vmem:[%s1864_s20 + $0xc8] sm:$0xff]  ;;  %v1096_v56 = vld [vmem:[%s1864_s20 + $0xd0] sm:$0xff] }
 0x457   : >> { %1093 = vst [vmem:[%s1860_s26 + $0xc0] sm:$0xff] %v1092_v54  ;;  %1095 = vst [vmem:[%s1860_s26 + $0xc8] sm:$0xff] %v1094_v55  ;;  %v1098_v57 = vld [vmem:[%s1864_s20 + $0xd8] sm:$0xff]  ;;  %v1100_v58 = vld [vmem:[%s1864_s20 + $0xe0] sm:$0xff] }
 0x458   : >> { %1097 = vst [vmem:[%s1860_s26 + $0xd0] sm:$0xff] %v1096_v56  ;;  %v1102_v59 = vld [vmem:[%s1864_s20 + $0xe8] sm:$0xff]  ;;  %1099 = vst [vmem:[%s1860_s26 + $0xd8] sm:$0xff] %v1098_v57  ;;  %v1104_v60 = vld [vmem:[%s1864_s20 + $0xf0] sm:$0xff] }
 0x459   : >> { %1101 = vst [vmem:[%s1860_s26 + $0xe0] sm:$0xff] %v1100_v58  ;;  %1103 = vst [vmem:[%s1860_s26 + $0xe8] sm:$0xff] %v1102_v59  ;;  %v1106_v61 = vld [vmem:[%s1864_s20 + $0xf8] sm:$0xff]  ;;  %v1108_v62 = vld [vmem:[%s1864_s20 + $0x100] sm:$0xff] }
 0x45a   : >> { %1105 = vst [vmem:[%s1860_s26 + $0xf0] sm:$0xff] %v1104_v60  ;;  %1107 = vst [vmem:[%s1860_s26 + $0xf8] sm:$0xff] %v1106_v61  ;;  %v1110_v63 = vld [vmem:[%s1864_s20 + $0x108] sm:$0xff]  ;;  %v1112_v1 = vld [vmem:[%s1864_s20 + $0x110] sm:$0xff] }
 0x45b   : >> { %1109 = vst [vmem:[%s1860_s26 + $0x100] sm:$0xff] %v1108_v62  ;;  %v1114_v2 = vld [vmem:[%s1864_s20 + $0x118] sm:$0xff]  ;;  %1111 = vst [vmem:[%s1860_s26 + $0x108] sm:$0xff] %v1110_v63  ;;  %v1116_v3 = vld [vmem:[%s1864_s20 + $0x120] sm:$0xff] }
 0x45c   : >> { %1113 = vst [vmem:[%s1860_s26 + $0x110] sm:$0xff] %v1112_v1  ;;  %1115 = vst [vmem:[%s1860_s26 + $0x118] sm:$0xff] %v1114_v2  ;;  %v1118_v4 = vld [vmem:[%s1864_s20 + $0x128] sm:$0xff]  ;;  %v1120_v5 = vld [vmem:[%s1864_s20 + $0x130] sm:$0xff] }
 0x45d   : >> { %1117 = vst [vmem:[%s1860_s26 + $0x120] sm:$0xff] %v1116_v3  ;;  %1119 = vst [vmem:[%s1860_s26 + $0x128] sm:$0xff] %v1118_v4  ;;  %v1122_v6 = vld [vmem:[%s1864_s20 + $0x138] sm:$0xff]  ;;  %v1124_v7 = vld [vmem:[%s1864_s20 + $0x140] sm:$0xff] }
 0x45e   : >> { %1121 = vst [vmem:[%s1860_s26 + $0x130] sm:$0xff] %v1120_v5  ;;  %v1126_v8 = vld [vmem:[%s1864_s20 + $0x148] sm:$0xff]  ;;  %1123 = vst [vmem:[%s1860_s26 + $0x138] sm:$0xff] %v1122_v6  ;;  %v1128_v9 = vld [vmem:[%s1864_s20 + $0x150] sm:$0xff] }
 0x45f   : >> { %1125 = vst [vmem:[%s1860_s26 + $0x140] sm:$0xff] %v1124_v7  ;;  %1127 = vst [vmem:[%s1860_s26 + $0x148] sm:$0xff] %v1126_v8  ;;  %v1130_v10 = vld [vmem:[%s1864_s20 + $0x158] sm:$0xff]  ;;  %v1132_v11 = vld [vmem:[%s1864_s20 + $0x160] sm:$0xff] }
 0x460   : >> { %1129 = vst [vmem:[%s1860_s26 + $0x150] sm:$0xff] %v1128_v9  ;;  %1131 = vst [vmem:[%s1860_s26 + $0x158] sm:$0xff] %v1130_v10  ;;  %v1134_v12 = vld [vmem:[%s1864_s20 + $0x168] sm:$0xff]  ;;  %v1136_v13 = vld [vmem:[%s1864_s20 + $0x170] sm:$0xff] }
 0x461   : >> { %1133 = vst [vmem:[%s1860_s26 + $0x160] sm:$0xff] %v1132_v11  ;;  %v1138_v14 = vld [vmem:[%s1864_s20 + $0x178] sm:$0xff]  ;;  %1135 = vst [vmem:[%s1860_s26 + $0x168] sm:$0xff] %v1134_v12  ;;  %v1140_v15 = vld [vmem:[%s1864_s20 + $0x180] sm:$0xff] }
 0x462   : >> { %1137 = vst [vmem:[%s1860_s26 + $0x170] sm:$0xff] %v1136_v13  ;;  %1139 = vst [vmem:[%s1860_s26 + $0x178] sm:$0xff] %v1138_v14  ;;  %v1142_v16 = vld [vmem:[%s1864_s20 + $0x188] sm:$0xff]  ;;  %v1144_v17 = vld [vmem:[%s1864_s20 + $0x190] sm:$0xff] }
 0x463   : >> { %1141 = vst [vmem:[%s1860_s26 + $0x180] sm:$0xff] %v1140_v15  ;;  %1143 = vst [vmem:[%s1860_s26 + $0x188] sm:$0xff] %v1142_v16  ;;  %v1146_v18 = vld [vmem:[%s1864_s20 + $0x198] sm:$0xff]  ;;  %v1148_v19 = vld [vmem:[%s1864_s20 + $0x1a0] sm:$0xff] }
 0x464   : >> { %1145 = vst [vmem:[%s1860_s26 + $0x190] sm:$0xff] %v1144_v17  ;;  %v1150_v20 = vld [vmem:[%s1864_s20 + $0x1a8] sm:$0xff]  ;;  %1147 = vst [vmem:[%s1860_s26 + $0x198] sm:$0xff] %v1146_v18  ;;  %v1152_v21 = vld [vmem:[%s1864_s20 + $0x1b0] sm:$0xff]  ;;  %1040 = sbr.rel (!%p1037_p8) target bundleno = 1098 (0x44a), region = 202 }
 0x465   : >> { %1149 = vst [vmem:[%s1860_s26 + $0x1a0] sm:$0xff] %v1148_v19  ;;  %1151 = vst [vmem:[%s1860_s26 + $0x1a8] sm:$0xff] %v1150_v20  ;;  %v1154_v22 = vld [vmem:[%s1864_s20 + $0x1b8] sm:$0xff]  ;;  %v1156_v23 = vld [vmem:[%s1864_s20 + $0x1c0] sm:$0xff] }
 0x466   : >> { %1153 = vst [vmem:[%s1860_s26 + $0x1b0] sm:$0xff] %v1152_v21  ;;  %1155 = vst [vmem:[%s1860_s26 + $0x1b8] sm:$0xff] %v1154_v22  ;;  %v1158_v24 = vld [vmem:[%s1864_s20 + $0x1c8] sm:$0xff]  ;;  %v1160_v0 = vld [vmem:[%s1864_s20 + $0x1d0] sm:$0xff] }
 0x467   : >> { %1157 = vst [vmem:[%s1860_s26 + $0x1c0] sm:$0xff] %v1156_v23  ;;  %v1162_v25 = vld [vmem:[%s1864_s20 + $0x1d8] sm:$0xff]  ;;  %1159 = vst [vmem:[%s1860_s26 + $0x1c8] sm:$0xff] %v1158_v24  ;;  %v1164_v26 = vld [vmem:[%s1864_s20 + $0x1e0] sm:$0xff] }
 0x468   : >> { %1161 = vst [vmem:[%s1860_s26 + $0x1d0] sm:$0xff] %v1160_v0  ;;  %1163 = vst [vmem:[%s1860_s26 + $0x1d8] sm:$0xff] %v1162_v25  ;;  %v1166_v27 = vld [vmem:[%s1864_s20 + $0x1e8] sm:$0xff]  ;;  %v1168_v28 = vld [vmem:[%s1864_s20 + $0x1f0] sm:$0xff] }
 0x469   : >> { %1165 = vst [vmem:[%s1860_s26 + $0x1e0] sm:$0xff] %v1164_v26  ;;  %1167 = vst [vmem:[%s1860_s26 + $0x1e8] sm:$0xff] %v1166_v27  ;;  %v1170_v29 = vld [vmem:[%s1864_s20 + $0x1f8] sm:$0xff]  ;;  %s2612_s20 = smov %s2429_s27 }
 0x46a   : >> { %1169 = vst [vmem:[%s1860_s26 + $0x1f0] sm:$0xff] %v1168_v28  ;;  %1171 = vst [vmem:[%s1860_s26 + $0x1f8] sm:$0xff] %v1170_v29  ;;  %s2611_s26 = smov %s2432_s21 }
 0x46b PF: > { %s2538_s13 = sand.u32 63, %s1031_s17   ;;  %s1437_s25 = sshll.u32 %s2362_s28, 13 }
 0x46c   : > { %s1183_s19 = sshra.s32 %s1437_s25, 4  ;;  %p1427_p7 = scmp.le.s32.totalorder %s2538_s13, 0 }
 0x46d   : > { %s1184_s11 = scalar_lea.vmem %s2142_s30, %s1183_s19 [#allocation4]   ;;  %s1187_s18 = scalar_lea.vmem %s2152_s23, %s1183_s19  }
 0x46e   : > { %1337 = sbr.rel (%p1427_p7) target bundleno = 1151 (0x47f), region = 207  ;;  %s1874_s27 = smov (!%p1427_p7), %s1187_s18  }
 0x46f   : > { %s1878_s22 = smov (!%p1427_p7), %s1184_s11   ;;  %s1882_s21 = smov (!%p1427_p7), 0  }
 0x470   : > { %s1886_s24 = smov (!%p1427_p7), 0  }
 0x475 LB: >> { %v1199_v30 = vld [vmem:[%s1880_s22] sm:$0xff]  ;;  %s1201_s17 = sadd.s32 1, %s1884_s21  ;;  %s1193_s24 = sadd.s32 1, %s1888_s24   ;;  %s1888_s24 = sphi %s1886_s24, %s1193_s24   ;;  %s1884_s21 = sphi %s1882_s21, %s1883_s21   ;;  %s1880_s22 = sphi %s1878_s22, %s1206_s22   ;;  %s1876_s27 = sphi %s1874_s27, %s1207_s27  }
 0x476   : >> { %1200 = vst [vmem:[%s1876_s27] sm:$0xff] %v1199_v30  ;;  %p1202_p13 = scmp.ge.s32.totalorder %s1201_s17, %s2538_s13  ;;  %p1192_p9 = scmp.ge.s32.totalorder %s1193_s24, %s2538_s13 }
 0x478   : >> { %s2643_s17 = smov (%p1202_p13, %s1201_s17), 0  ;;  %1195 = sbr.rel (!%p1192_p9) target bundleno = 1141 (0x475), region = 213 }
 0x479   : >> { %s1428_s28 = sshll.u32 %s2643_s17, 3  ;;  %s1883_s21 = smov %s2643_s17  }
 0x47a   : >> { %s1206_s22 = scalar_lea.vmem %s1184_s11, %s1428_s28 [#allocation4]   ;;  %s1207_s27 = scalar_lea.vmem %s1187_s18, %s1428_s28  }
 0x47f PF: > { %s1895_s26 = smov 0   ;;  %s2614_s29 = scalar_lea.vmem %s2142_s30, %s2353_s9 [#allocation4] }
 0x480   : > { %s1208_s20 = sshllo.u32 %s1895_s26, %s2158_s12  ;;  %s2615_s25 = scalar_lea.vmem %s2152_s23, %s2353_s9 }
 0x481   : > { %v1217_v31 = vld [vmem:[%s2614_s29] sm:%s1208_s20] }
 0x482   : > { %1218 = vst [vmem:[%s2615_s25] sm:%s1208_s20] %v1217_v31 }
 0x483 PF: > { %p1430_p10 = scmp.ge.u32.totalorder %s2154_s14, 8 }
 0x484   : > { %s1896_s19 = smov (!%p1430_p10), 0  }
 0x485   : > { %829 = sbr.rel (%p1430_p10) target bundleno = 1164 (0x48c), region = 76  ;;  %s830_s18 = sshllo.u32 (!%p1430_p10), %s1896_s19, %s2154_s14 }
 0x486   : > { %v839_v32 = vld [vmem:[%s2142_s30] sm:%s830_s18] (!%p1430_p10) }
 0x487   : > { %840 = vst [vmem:[%s2152_s23] sm:%s830_s18] (!%p1430_p10), %v839_v32 }
 0x48c PF: > { %s22_s16 = sadd.s32 1, %s1824_s16   ;;  %s2616_s12 = sld [smem:[#allocation6_spill]] }
 0x48d   : > { %p19_p11 = scmp.ge.s32.totalorder %s22_s16, 6   ;;  %s2617_s11 = sld [smem:[#allocation10_spill]] }
 0x48e   : > { %s2618_s9 = sld [smem:[#allocation7_spill]]  ;;  %s2619_s14 = sld [smem:[#allocation8_spill]] }
 0x48f   : > { %s2620_s27 = sld [smem:[#allocation9_spill]]  ;;  %s2621_s30 = smov %s1800_s10 }
 0x490   : > { %s2624_s13 = smov %s1820_s15  ;;  %21 = sbr.rel (!%p19_p11) target bundleno = 7 (0x7), region = 224 }
 0x492   : > { %s2622_s10 = smov %s2616_s12 }
 0x494   : > { %s2623_s12 = smov %s2618_s9 }
 0x495   : > { %s2625_s15 = smov %s2620_s27 }
 0x497   :  { %1232 = vsyncpa [#allocation3], 1 }
 0x498   :  { %1234 = vsyncpa [#allocation3 + $0x1], 1 }

</bundles_post_ra>
